<compile_context>
chip_gen: v5e
topology: v5e:2x2
jax: 0.10.0
libtpu: 0.0.40
codegen_flags: <defaults>
</compile_context>

<pallas_src>
import functools

import jax
import jax.numpy as jnp
from jax.experimental import pallas as pl
from jax.experimental.pallas import tpu as pltpu


# ----------------------------------------------------------------------------
# Fused kernel: one grid step = one critic.
#   encoder:  z = relu(x @ W1 + b1) @ W2 + b2          (MXU)
#   losses:   local  = lag * mean(relu(d(zx,zy) - step_cost)^2)
#             global = mean(softplus(offset - d(zx, roll(zy,1))))
# ----------------------------------------------------------------------------
def _fused_qrl_kernel(lag_ref,                      # SMEM (C,) f32
                      obs_ref, next_ref,            # VMEM (B, D)
                      w1_ref, b1_ref, w2_ref, b2_ref,  # VMEM per-critic slices
                      out_ref,                      # VMEM (1, 2, 128)
                      *, step_cost, offset, use_bf16_matmul):
    c = pl.program_id(0)

    w1 = w1_ref[0]          # (D, H)
    b1 = b1_ref[0]          # (1, H)
    w2 = w2_ref[0]          # (H, L)
    b2 = b2_ref[0]          # (1, L)

    mm_dtype = jnp.bfloat16 if use_bf16_matmul else jnp.float32

    def encode(x):
        h = jnp.dot(x.astype(mm_dtype), w1.astype(mm_dtype),
                    preferred_element_type=jnp.float32) + b1
        h = jnp.maximum(h, 0.0)
        z = jnp.dot(h.astype(mm_dtype), w2.astype(mm_dtype),
                    preferred_element_type=jnp.float32) + b2
        return z

    zx = encode(obs_ref[...])       # (B, L) f32
    zy = encode(next_ref[...])      # (B, L) f32

    # "random goals" = batch-rotated next-state latents; done in-kernel on the
    # XLU (sublane rotation), no extra HBM traffic.
    zy_neg = pltpu.roll(zy, shift=1, axis=0)

    B = zx.shape[0]

    # Per-sample quasimetric distances, kept 2D as (B, 1).
    d_local = jnp.sum(jnp.maximum(zy - zx, 0.0), axis=-1, keepdims=True)
    d_neg = jnp.sum(jnp.maximum(zy_neg - zx, 0.0), axis=-1, keepdims=True)

    # Local constraint: lagrange-weighted squared excess over step cost.
    lag = lag_ref[c]                                               # SMEM scalar
    sq_dev = jnp.square(jnp.maximum(d_local - step_cost, 0.0))     # (B, 1)
    local_11 = lag * (jnp.sum(sq_dev, axis=0, keepdims=True) / B)  # (1, 1)

    # Global push: numerically-stable softplus(offset - d_neg).
    t = offset - d_neg                                             # (B, 1)
    sp = jnp.maximum(t, 0.0) + jnp.log1p(jnp.exp(-jnp.abs(t)))     # (B, 1)
    glob_11 = jnp.sum(sp, axis=0, keepdims=True) / B               # (1, 1)

    # Lane-dense output row: (1, 2, 128), losses broadcast across lanes so the
    # store is an unmasked full-width vst.
    vals = jnp.concatenate([local_11, glob_11], axis=0)            # (2, 1)
    out_ref[...] = jnp.broadcast_to(vals[None], (1, 2, 128))


def qrl_critic_losses(observations, next_observations, params,
                      *, step_cost=1.0, offset=15.0, use_bf16_matmul=False):
    """Run all critics in one pallas_call.

    params: dict with stacked critic parameters:
      w1 (C, D, H), b1 (C, 1, H), w2 (C, H, L), b2 (C, 1, L), lagrange (C,)
    Returns (C, 2) float32: column 0 = local constraint, column 1 = global push.
    """
    B, D = observations.shape
    C, _, H = params["w1"].shape
    L = params["w2"].shape[2]

    kern = functools.partial(_fused_qrl_kernel, step_cost=step_cost,
                             offset=offset, use_bf16_matmul=use_bf16_matmul)

    out = pl.pallas_call(
        kern,
        out_shape=jax.ShapeDtypeStruct((C, 2, 128), jnp.float32),
        grid=(C,),
        in_specs=[
            # lagrange multipliers: scalar table in SMEM (no VMEM tile / vld).
            pl.BlockSpec(memory_space=pltpu.MemorySpace.SMEM),
            # observations / next_observations: full blocks, shared by all
            # critics (no concatenate copy).
            pl.BlockSpec((B, D), lambda c: (0, 0)),
            pl.BlockSpec((B, D), lambda c: (0, 0)),
            # per-critic weight slices selected by the grid index.
            pl.BlockSpec((1, D, H), lambda c: (c, 0, 0)),
            pl.BlockSpec((1, 1, H), lambda c: (c, 0, 0)),
            pl.BlockSpec((1, H, L), lambda c: (c, 0, 0)),
            pl.BlockSpec((1, 1, L), lambda c: (c, 0, 0)),
        ],
        out_specs=pl.BlockSpec((1, 2, 128), lambda c: (c, 0, 0)),
        compiler_params=pltpu.CompilerParams(
            # critic axis is embarrassingly parallel -> one critic per
            # TensorCore on v7x; harmless on v5e/v6e.
            dimension_semantics=("parallel",),
        ),
    )(params["lagrange"], observations, next_observations,
      params["w1"], params["b1"], params["w2"], params["b2"])

    return out[:, :, 0]                     # (C, 2): [local, global] per critic


# ----------------------------------------------------------------------------
# QRLLosses.forward  (mirrors LossResult.combine)
# ----------------------------------------------------------------------------
def qrl_losses_forward(observations, next_observations, params,
                       *, step_cost=1.0, offset=15.0, use_bf16_matmul=False):
    per_critic = qrl_critic_losses(
        observations, next_observations, params,
        step_cost=step_cost, offset=offset, use_bf16_matmul=use_bf16_matmul)

    total = jnp.sum(per_critic)             # LossResult.combine: sum everything
    infos = {}
    n_critics = per_critic.shape[0]
    for idx in range(n_critics):
        infos[f"critic_{idx:02d}/local_constraint"] = per_critic[idx, 0]
        infos[f"critic_{idx:02d}/global_push"] = per_critic[idx, 1]
    return total, infos


# ----------------------------------------------------------------------------
# Deterministic parameter construction + smoke test
# ----------------------------------------------------------------------------
def make_stacked_critic_params(key, n_critics, obs_dim, hidden, latent):
    keys = jax.random.split(key, 2 * n_critics)
    w1 = jnp.stack([jax.random.normal(keys[2 * i], (obs_dim, hidden),
                                      jnp.float32) * 0.1
                    for i in range(n_critics)])                    # (C, D, H)
    w2 = jnp.stack([jax.random.normal(keys[2 * i + 1], (hidden, latent),
                                      jnp.float32) * 0.1
                    for i in range(n_critics)])                    # (C, H, L)
    return {
        "w1": w1,
        "b1": jnp.zeros((n_critics, 1, hidden), jnp.float32),
        "w2": w2,
        "b2": jnp.zeros((n_critics, 1, latent), jnp.float32),
        "lagrange": jnp.ones((n_critics,), jnp.float32),   # ~softplus(raw)=1
    }


if __name__ == "__main__":
    B, OBS, HID, LAT, N_CRITICS = 16, 32, 64, 32, 2

    key = jax.random.PRNGKey(0)
    k_obs, k_next, k_crit = jax.random.split(key, 3)
    observations = jax.random.normal(k_obs, (B, OBS), jnp.float32)
    next_observations = jax.random.normal(k_next, (B, OBS), jnp.float32)
    params = make_stacked_critic_params(k_crit, N_CRITICS, OBS, HID, LAT)

    total, infos = jax.jit(qrl_losses_forward)(
        observations, next_observations, params)
    jax.block_until_ready(total)
    for v in infos.values():
        jax.block_until_ready(v)
    print("KERNEL_OK")
</pallas_src>

<mosaic_0001>
module attributes {stable_mosaic.version = 11 : i64} {
  func.func @_fused_qrl_kernel(%arg0: i32, %arg1: memref<2xf32, #tpu.memory_space<smem>>, %arg2: memref<16x32xf32, #tpu.memory_space<vmem>>, %arg3: memref<16x32xf32, #tpu.memory_space<vmem>>, %arg4: memref<1x32x64xf32, #tpu.memory_space<vmem>>, %arg5: memref<1x1x64xf32, #tpu.memory_space<vmem>>, %arg6: memref<1x64x32xf32, #tpu.memory_space<vmem>>, %arg7: memref<1x1x32xf32, #tpu.memory_space<vmem>>, %arg8: memref<1x2x128xf32, #tpu.memory_space<vmem>>) attributes {dimension_semantics = [#tpu.dimension_semantics<parallel>], iteration_bounds = array<i64: 2>, scalar_prefetch = 0 : i64, scratch_operands = 0 : i64, tpu.core_type = #tpu.core_type<tc>, window_params = [{transform_indices = @transform_0, window_bounds = array<i64: 2>}, {pipeline_mode = #tpu.pipeline_mode<synchronous>, transform_indices = @transform_1, window_bounds = array<i64: 16, 32>}, {pipeline_mode = #tpu.pipeline_mode<synchronous>, transform_indices = @transform_2, window_bounds = array<i64: 16, 32>}, {transform_indices = @transform_3, window_bounds = array<i64: 1, 32, 64>}, {transform_indices = @transform_4, window_bounds = array<i64: 1, 1, 64>}, {transform_indices = @transform_5, window_bounds = array<i64: 1, 64, 32>}, {transform_indices = @transform_6, window_bounds = array<i64: 1, 1, 32>}, {transform_indices = @transform_7, window_bounds = array<i64: 1, 2, 128>}]} {
    %c0 = arith.constant 0 : index
    %c0_0 = arith.constant 0 : index
    %c0_1 = arith.constant 0 : index
    %0 = vector.load %arg4[%c0, %c0_0, %c0_1] : memref<1x32x64xf32, #tpu.memory_space<vmem>>, vector<1x32x64xf32>
    %1 = vector.shape_cast %0 : vector<1x32x64xf32> to vector<32x64xf32>
    %c0_2 = arith.constant 0 : index
    %c0_3 = arith.constant 0 : index
    %c0_4 = arith.constant 0 : index
    %2 = vector.load %arg5[%c0_2, %c0_3, %c0_4] : memref<1x1x64xf32, #tpu.memory_space<vmem>>, vector<1x1x64xf32>
    %3 = vector.shape_cast %2 : vector<1x1x64xf32> to vector<1x64xf32>
    %c0_5 = arith.constant 0 : index
    %c0_6 = arith.constant 0 : index
    %c0_7 = arith.constant 0 : index
    %4 = vector.load %arg6[%c0_5, %c0_6, %c0_7] : memref<1x64x32xf32, #tpu.memory_space<vmem>>, vector<1x64x32xf32>
    %5 = vector.shape_cast %4 : vector<1x64x32xf32> to vector<64x32xf32>
    %c0_8 = arith.constant 0 : index
    %c0_9 = arith.constant 0 : index
    %c0_10 = arith.constant 0 : index
    %6 = vector.load %arg7[%c0_8, %c0_9, %c0_10] : memref<1x1x32xf32, #tpu.memory_space<vmem>>, vector<1x1x32xf32>
    %7 = vector.shape_cast %6 : vector<1x1x32xf32> to vector<1x32xf32>
    %c0_11 = arith.constant 0 : index
    %c0_12 = arith.constant 0 : index
    %8 = vector.load %arg2[%c0_11, %c0_12] : memref<16x32xf32, #tpu.memory_space<vmem>>, vector<16x32xf32>
    %cst = arith.constant dense<0.000000e+00> : vector<16x64xf32>
    %9 = tpu.matmul %8, %1, %cst {dimension_numbers = #tpu.dot_dimension_numbers<[1], [0], [0], [1], [0, 0, 1, 1], [], []>} : vector<16x32xf32>, vector<32x64xf32>, vector<16x64xf32> -> vector<16x64xf32>
    %10 = vector.broadcast %3 : vector<1x64xf32> to vector<16x64xf32>
    %11 = arith.addf %9, %10 : vector<16x64xf32>
    %cst_13 = arith.constant 0.000000e+00 : f32
    %12 = vector.broadcast %cst_13 : f32 to vector<16x64xf32>
    %13 = arith.maximumf %11, %12 : vector<16x64xf32>
    %cst_14 = arith.constant dense<0.000000e+00> : vector<16x32xf32>
    %14 = tpu.matmul %13, %5, %cst_14 {dimension_numbers = #tpu.dot_dimension_numbers<[1], [0], [0], [1], [0, 0, 1, 1], [], []>} : vector<16x64xf32>, vector<64x32xf32>, vector<16x32xf32> -> vector<16x32xf32>
    %15 = vector.broadcast %7 : vector<1x32xf32> to vector<16x32xf32>
    %16 = arith.addf %14, %15 : vector<16x32xf32>
    %c0_15 = arith.constant 0 : index
    %c0_16 = arith.constant 0 : index
    %17 = vector.load %arg3[%c0_15, %c0_16] : memref<16x32xf32, #tpu.memory_space<vmem>>, vector<16x32xf32>
    %cst_17 = arith.constant dense<0.000000e+00> : vector<16x64xf32>
    %18 = tpu.matmul %17, %1, %cst_17 {dimension_numbers = #tpu.dot_dimension_numbers<[1], [0], [0], [1], [0, 0, 1, 1], [], []>} : vector<16x32xf32>, vector<32x64xf32>, vector<16x64xf32> -> vector<16x64xf32>
    %19 = vector.broadcast %3 : vector<1x64xf32> to vector<16x64xf32>
    %20 = arith.addf %18, %19 : vector<16x64xf32>
    %cst_18 = arith.constant 0.000000e+00 : f32
    %21 = vector.broadcast %cst_18 : f32 to vector<16x64xf32>
    %22 = arith.maximumf %20, %21 : vector<16x64xf32>
    %cst_19 = arith.constant dense<0.000000e+00> : vector<16x32xf32>
    %23 = tpu.matmul %22, %5, %cst_19 {dimension_numbers = #tpu.dot_dimension_numbers<[1], [0], [0], [1], [0, 0, 1, 1], [], []>} : vector<16x64xf32>, vector<64x32xf32>, vector<16x32xf32> -> vector<16x32xf32>
    %24 = vector.broadcast %7 : vector<1x32xf32> to vector<16x32xf32>
    %25 = arith.addf %23, %24 : vector<16x32xf32>
    %c1_i32 = arith.constant 1 : i32
    %26 = tpu.dynamic_rotate %25 by %c1_i32 dim 0 : vector<16x32xf32>, i32 -> vector<16x32xf32>
    %27 = arith.subf %25, %16 : vector<16x32xf32>
    %cst_20 = arith.constant 0.000000e+00 : f32
    %28 = vector.broadcast %cst_20 : f32 to vector<16x32xf32>
    %29 = arith.maximumf %27, %28 : vector<16x32xf32>
    %cst_21 = arith.constant dense<0.000000e+00> : vector<16xf32>
    %30 = vector.multi_reduction <add>, %29, %cst_21 [1] : vector<16x32xf32> to vector<16xf32>
    %31 = vector.shape_cast %30 : vector<16xf32> to vector<16x1xf32>
    %32 = arith.subf %26, %16 : vector<16x32xf32>
    %cst_22 = arith.constant 0.000000e+00 : f32
    %33 = vector.broadcast %cst_22 : f32 to vector<16x32xf32>
    %34 = arith.maximumf %32, %33 : vector<16x32xf32>
    %cst_23 = arith.constant dense<0.000000e+00> : vector<16xf32>
    %35 = vector.multi_reduction <add>, %34, %cst_23 [1] : vector<16x32xf32> to vector<16xf32>
    %36 = vector.shape_cast %35 : vector<16xf32> to vector<16x1xf32>
    %37 = arith.index_cast %arg0 : i32 to index
    %38 = memref.load %arg1[%37] : memref<2xf32, #tpu.memory_space<smem>>
    %cst_24 = arith.constant 1.000000e+00 : f32
    %39 = vector.broadcast %cst_24 : f32 to vector<16x1xf32>
    %40 = arith.subf %31, %39 : vector<16x1xf32>
    %cst_25 = arith.constant 0.000000e+00 : f32
    %41 = vector.broadcast %cst_25 : f32 to vector<16x1xf32>
    %42 = arith.maximumf %40, %41 : vector<16x1xf32>
    %43 = arith.mulf %42, %42 : vector<16x1xf32>
    %cst_26 = arith.constant dense<0.000000e+00> : vector<1xf32>
    %44 = vector.multi_reduction <add>, %43, %cst_26 [0] : vector<16x1xf32> to vector<1xf32>
    %45 = vector.shape_cast %44 : vector<1xf32> to vector<1x1xf32>
    %cst_27 = arith.constant 1.600000e+01 : f32
    %46 = vector.broadcast %cst_27 : f32 to vector<1x1xf32>
    %47 = arith.divf %45, %46 : vector<1x1xf32>
    %48 = vector.broadcast %38 : f32 to vector<1x1xf32>
    %49 = arith.mulf %48, %47 : vector<1x1xf32>
    %cst_28 = arith.constant 1.500000e+01 : f32
    %50 = vector.broadcast %cst_28 : f32 to vector<16x1xf32>
    %51 = arith.subf %50, %36 : vector<16x1xf32>
    %cst_29 = arith.constant 0.000000e+00 : f32
    %52 = vector.broadcast %cst_29 : f32 to vector<16x1xf32>
    %53 = arith.maximumf %51, %52 : vector<16x1xf32>
    %54 = math.absf %51 : vector<16x1xf32>
    %cst_30 = arith.constant 0.000000e+00 : f32
    %55 = vector.broadcast %cst_30 : f32 to vector<16x1xf32>
    %56 = arith.subf %55, %54 : vector<16x1xf32>
    %57 = math.exp %56 : vector<16x1xf32>
    %58 = math.log1p %57 : vector<16x1xf32>
    %59 = arith.addf %53, %58 : vector<16x1xf32>
    %cst_31 = arith.constant dense<0.000000e+00> : vector<1xf32>
    %60 = vector.multi_reduction <add>, %59, %cst_31 [0] : vector<16x1xf32> to vector<1xf32>
    %61 = vector.shape_cast %60 : vector<1xf32> to vector<1x1xf32>
    %cst_32 = arith.constant 1.600000e+01 : f32
    %62 = vector.broadcast %cst_32 : f32 to vector<1x1xf32>
    %63 = arith.divf %61, %62 : vector<1x1xf32>
    %64 = tpu.concatenate %49, %63 in 0 : vector<1x1xf32>, vector<1x1xf32> -> vector<2x1xf32>
    %65 = vector.shape_cast %64 : vector<2x1xf32> to vector<1x2x1xf32>
    %66 = vector.shape_cast %65 : vector<1x2x1xf32> to vector<1x2x1xf32>
    %67 = vector.broadcast %66 : vector<1x2x1xf32> to vector<1x2x128xf32>
    %c0_33 = arith.constant 0 : index
    %c0_34 = arith.constant 0 : index
    %c0_35 = arith.constant 0 : index
    %68 = vector.load %arg8[%c0_33, %c0_34, %c0_35] : memref<1x2x128xf32, #tpu.memory_space<vmem>>, vector<1x2x128xf32>
    tpu.vector_store %arg8[%c0_33, %c0_34, %c0_35], %67 {strides = array<i32>} : memref<1x2x128xf32, #tpu.memory_space<vmem>>, vector<1x2x128xf32>,
    return
  }
  func.func @transform_0(%arg0: i32) -> i32 {
    %c0_i32 = arith.constant 0 : i32
    %c0_i32_0 = arith.constant 0 : i32
    return %c0_i32 : i32
  }
  func.func @transform_1(%arg0: i32) -> (i32, i32) {
    %c0_i32 = arith.constant 0 : i32
    %c0_i32_0 = arith.constant 0 : i32
    %c0_i32_1 = arith.constant 0 : i32
    return %c0_i32, %c0_i32_0 : i32, i32
  }
  func.func @transform_2(%arg0: i32) -> (i32, i32) {
    %c0_i32 = arith.constant 0 : i32
    %c0_i32_0 = arith.constant 0 : i32
    %c0_i32_1 = arith.constant 0 : i32
    return %c0_i32, %c0_i32_0 : i32, i32
  }
  func.func @transform_3(%arg0: i32) -> (i32, i32, i32) {
    %c0_i32 = arith.constant 0 : i32
    %c0_i32_0 = arith.constant 0 : i32
    %c0_i32_1 = arith.constant 0 : i32
    return %arg0, %c0_i32, %c0_i32_0 : i32, i32, i32
  }
  func.func @transform_4(%arg0: i32) -> (i32, i32, i32) {
    %c0_i32 = arith.constant 0 : i32
    %c0_i32_0 = arith.constant 0 : i32
    %c0_i32_1 = arith.constant 0 : i32
    return %arg0, %c0_i32, %c0_i32_0 : i32, i32, i32
  }
  func.func @transform_5(%arg0: i32) -> (i32, i32, i32) {
    %c0_i32 = arith.constant 0 : i32
    %c0_i32_0 = arith.constant 0 : i32
    %c0_i32_1 = arith.constant 0 : i32
    return %arg0, %c0_i32, %c0_i32_0 : i32, i32, i32
  }
  func.func @transform_6(%arg0: i32) -> (i32, i32, i32) {
    %c0_i32 = arith.constant 0 : i32
    %c0_i32_0 = arith.constant 0 : i32
    %c0_i32_1 = arith.constant 0 : i32
    return %arg0, %c0_i32, %c0_i32_0 : i32, i32, i32
  }
  func.func @transform_7(%arg0: i32) -> (i32, i32, i32) {
    %c0_i32 = arith.constant 0 : i32
    %c0_i32_0 = arith.constant 0 : i32
    %c0_i32_1 = arith.constant 0 : i32
    return %arg0, %c0_i32, %c0_i32_0 : i32, i32, i32
  }
}

</mosaic_0001>

<bundles_post_ra>
// kernel: qrl_losses_forward.1
= control target key start
LH: loop header
LB: loop body
LE: loop exit
PB: predicated region body
PF: predicated region fallthrough
CT: control target
= control target key end

     0   :  { %12 = vsyncpa [#allocation3], 0  ;;  %s810_s24 = smov 0   ;;  %s887_s0 = inlined_call_operand.vmem [shape: f32[2], index: 0, kind: input, shape index: {}]   ;;  %s888_s1 = inlined_call_operand.vmem [shape: f32[16,32], index: 1, kind: input, shape index: {}]   ;;  %s889_s2 = inlined_call_operand.vmem [shape: f32[16,32], index: 2, kind: input, shape index: {}]   ;;  %s890_s3 = inlined_call_operand.vmem [shape: f32[2,32,64], index: 3, kind: input, shape index: {}]   ;;  %s891_s4 = inlined_call_operand.vmem [shape: f32[2,1,64], index: 4, kind: input, shape index: {}]   ;;  %s892_s5 = inlined_call_operand.vmem [shape: f32[2,64,32], index: 5, kind: input, shape index: {}]   ;;  %s893_s6 = inlined_call_operand.vmem [shape: f32[2,1,32], index: 6, kind: input, shape index: {}]   ;;  %s894_s7 = inlined_call_operand.vmem [shape: f32[2,2,128], index: 7, kind: output, shape index: {}]  }
   0x1 LB: > { %s816_s25 = sadd.s32 4294967295, %s765_s24   ;;  %p681_p0 = scmp.ge.s32.totalorder %s765_s24, 1  ;;  %s765_s24 = sphi %s810_s24, %s18_s24  }
   0x2   : > { %p216_p1 = scmp.lt.s32.totalorder %s765_s24, 3  ;;  %s228_s28 = sshll.u32 %s887_s0, 4  ;;  %s229_s28 = int_to_ptr.vmem [resolvable:$true] %s228_s28 }
   0x3   : > { %p713_p3 = scmp.eq.s32.totalorder %s816_s25, 0  ;;  %s767_s29 = smov [#allocation2]  }
   0x4   : > { %p217_p2 = pnand %p681_p0, %p216_p1 }
   0x6   : > { %p709_p4 = pneg %p217_p2  ;;  %275 = sbr.rel (%p217_p2) target bundleno = 576 (0x240), region = 48 }
   0x8   : > { %p710_p5 = pnand %p713_p3, %p709_p4 }
   0xa   : > { %712 = dma.vmem_to_smem (!%p710_p5), %s229_s28, 16, %s767_s29, [#allocation3]  }
   0xb   : > { %760 = dma.done.wait (%p713_p3), [#allocation3], 16  }
   0xc   : > { %762 = vsyncadd (%p713_p3), [#allocation3], 4294967280 }
   0xd   : > { %282 = sfence }
   0xe   : > { %p319_p6 = scmp.lt.s32.totalorder %s816_s25, 1  ;;  %vm358_vm0 = vcmask 261120   ;;  %v423_v7 = vld [vmem:[%s889_s2] sm:$0xff]  ;;  %v424_v11 = vld [vmem:[%s889_s2 + $0x8] sm:$0xff]  ;;  %vm393_vm1 = vcmask 523264   ;;  %v487_v34 = vlaneseq  ;;  %vm576_vm6 = vcmask 1040384  }
   0xf   : > { %v353_v8 = vld [vmem:[%s888_s1] sm:$0xff]  ;;  %v354_v12 = vld [vmem:[%s888_s1 + $0x8] sm:$0xff] }
  0x10   : > { %s826_s30 = scalar_select %p319_p6, %s816_s25, 1  ;;  %v488_v38 = vshrl.u32 %v487_v34, 7 }
  0x12   : > { %s703_s8 = sshll.u32 %s826_s30, 5  ;;  %s704_s9 = sshll.u32 %s826_s30, 6  ;;  %vm489_vm2 = vcmp.lt.s32.totalorder %v488_v38, 1 }
  0x13   : > { %s323_s12 = scalar_lea.vmem %s890_s3, %s703_s8  ;;  %s836_s15 = scalar_lea.vmem %s892_s5, %s704_s9 }
  0x14   : > { %v342_v0 = vld [vmem:[%s323_s12 + $0x18] sm:$0xff]  ;;  %v341_v1 = vld [vmem:[%s323_s12 + $0x10] sm:$0xff]  ;;  %v340_v4 = vld [vmem:[%s323_s12 + $0x8] sm:$0xff]  ;;  %s326_s18 = scalar_lea.vmem %s891_s4, %s826_s30  ;;  %s334_s9 = scalar_lea.vmem %s893_s6, %s826_s30 }
  0x15   : > { %443 = vmatpush.msra.mxu2 %v342_v0  ;;  %377 = vmatpush.msra.mxu0 %v342_v0  ;;  %v351_v2 = vld [vmem:[%s836_s15 + $0x38] sm:$0xff]  ;;  %v350_v3 = vld [vmem:[%s836_s15 + $0x30] sm:$0xff]  ;;  %v349_v5 = vld [vmem:[%s836_s15 + $0x28] sm:$0xff]  ;;  %s690_s13 = sshll.u32 %s826_s30, 1 }
  0x16   : > { %470 = vmatpush.msra.mxu3 %v351_v2  ;;  %408 = vmatpush.msra.mxu1 %v351_v2  ;;  %v339_v6 = vld [vmem:[%s323_s12] sm:$0xff]  ;;  %v347_v10 = vld [vmem:[%s836_s15 + $0x18] sm:$0xff]  ;;  %v346_v13 = vld [vmem:[%s836_s15 + $0x10] sm:$0xff]  ;;  %s512_s12 = sld [smem:[#allocation2 + %s816_s25]] }
  0x17   : > { %444 = vmatpush.msra.mxu2 %v341_v1  ;;  %378 = vmatpush.msra.mxu0 %v341_v1  ;;  %v348_v9 = vld [vmem:[%s836_s15 + $0x20] sm:$0xff]  ;;  %v345_v14 = vld [vmem:[%s836_s15 + $0x8] sm:$0xff] }
  0x18   : > { %471 = vmatpush.msra.mxu3 %v350_v3  ;;  %409 = vmatpush.msra.mxu1 %v350_v3  ;;  %v344_v15 = vld [vmem:[%s836_s15] sm:$0xff]  ;;  %s338_s15 = scalar_lea.vmem %s894_s7, %s690_s13 }
  0x19   : > { %445 = vmatpush.msra.mxu2 %v340_v4  ;;  %379 = vmatpush.msra.mxu0 %v340_v4  ;;  %v728_v16 = vld [vmem:[%s326_s18] ss:$0 sm:$0xff] }
  0x1a   : > { %472 = vmatpush.msra.mxu3 %v349_v5  ;;  %410 = vmatpush.msra.mxu1 %v349_v5  ;;  %v729_v30 = vld [vmem:[%s334_s9] ss:$0 sm:$0xff] }
  0x1b   : > { %446 = vmatpush.msra.mxu2 %v339_v6  ;;  %380 = vmatpush.msra.mxu0 %v339_v6  ;;  %v768_v6 = vmov 0  }
  0x1c   : > { %695 = vmatmul.msk.f32.vlgmr.msra.gmra.mxu2 %vm358_vm0, %v423_v7  ;;  %691 = vmatmul.msk.f32.vlgmr.msra.gmra.mxu0 %vm358_vm0, %v353_v8 }
  0x1d   : > { %473 = vmatpush.msra.mxu3 %v348_v9  ;;  %411 = vmatpush.msra.mxu1 %v348_v9 }
  0x1e   : > { %726 = vset.pattern.permute.xlu2 %v768_v6  ;;  %727 = vset.pattern.permute.xlu0 %v768_v6 }
  0x1f   : > { %474 = vmatpush.msra.mxu3 %v347_v10  ;;  %412 = vmatpush.msra.mxu1 %v347_v10 }
  0x21   : > { %475 = vmatpush.msra.mxu3 %v346_v13  ;;  %413 = vmatpush.msra.mxu1 %v346_v13  ;;  %v769_v13 = vmov 16.0  }
  0x23   : > { %476 = vmatpush.msra.mxu3 %v345_v14  ;;  %414 = vmatpush.msra.mxu1 %v345_v14 }
  0x24   : > { %696 = vmatmul.msk.f32.gmra.mxu2 %vm358_vm0, %v424_v11  ;;  %692 = vmatmul.msk.f32.gmra.mxu0 %vm358_vm0, %v354_v12 }
  0x25   : > { %477 = vmatpush.msra.mxu3 %v344_v15  ;;  %415 = vmatpush.msra.mxu1 %v344_v15 }
  0x99   : > { %v382_v17 = vpop.f32.mrf.mxu0 }
  0x9a   : > { %v383_v18 = vadd.f32 %v728_v16, %v382_v17 }
  0x9c   : > { %v388_v19 = vmax.f32 %v383_v18, 0.0 }
  0x9e   : > { %693 = vmatmul.msk.f32.vlgmr.msra.gmra.mxu1 %vm393_vm1, %v388_v19 }
  0x9f   : > { %v448_v20 = vpop.f32.mrf.mxu2 }
  0xa0   : > { %v449_v21 = vadd.f32 %v728_v16, %v448_v20 }
  0xa1   : > { %v385_v22 = vpop.f32.mrf.mxu0 }
  0xa2   : > { %v454_v23 = vmax.f32 %v449_v21, 0.0  ;;  %v386_v24 = vadd.f32 %v728_v16, %v385_v22 }
  0xa4   : > { %697 = vmatmul.msk.f32.vlgmr.msra.gmra.mxu3 %vm393_vm1, %v454_v23  ;;  %v389_v25 = vmax.f32 %v386_v24, 0.0 }
  0xa6   : > { %694 = vmatmul.msk.f32.gmra.mxu1 %vm393_vm1, %v389_v25 }
  0xa7   : > { %v451_v26 = vpop.f32.mrf.mxu2 }
  0xa8   : > { %v452_v27 = vadd.f32 %v728_v16, %v451_v26 }
  0xaa   : > { %v455_v28 = vmax.f32 %v452_v27, 0.0 }
  0xac   : > { %698 = vmatmul.msk.f32.gmra.mxu3 %vm393_vm1, %v455_v28 }
 0x11b   : > { %v417_v29 = vpop.f32.mrf.mxu1 }
 0x11c   : > { %v418_v31 = vadd.f32 %v729_v30, %v417_v29 }
 0x123   : > { %v420_v36 = vpop.f32.mrf.mxu1 }
 0x124   : > { %v421_v39 = vadd.f32 %v729_v30, %v420_v36 }
 0x127   : > { %v479_v32 = vpop.f32.mrf.mxu3 }
 0x128   : > { %v480_v33 = vadd.f32 %v729_v30, %v479_v32 }
 0x12a   : > { %v492_v35 = vsub.f32 %v480_v33, %v418_v31  ;;  %v485_v43 = vrot.slane %v480_v33, 7 }
 0x12c   : > { %v494_v37 = vmax.f32 %v492_v35, 0.0 }
 0x12e   : > { %v496_v40 = vsel %vm358_vm0, %v494_v37, 0.0 }
 0x12f   : > { %v482_v41 = vpop.f32.mrf.mxu3  ;;  %497 = vadd.xlane.f32.xlu1 %v496_v40 }
 0x130   : > { %v483_v42 = vadd.f32 %v729_v30, %v482_v41 }
 0x132   : > { %v486_v44 = vrot.slane %v483_v42, 7  ;;  %v493_v45 = vsub.f32 %v483_v42, %v421_v39 }
 0x134   : > { %v495_v46 = vmax.f32 %v493_v45, 0.0  ;;  %v491_v47 = vsel %vm489_vm2, %v486_v44, %v485_v43  ;;  %v490_v50 = vsel %vm489_vm2, %v485_v43, %v486_v44 }
 0x135   : > { %v502_v48 = vsub.f32 %v491_v47, %v418_v31  ;;  %v503_v53 = vsub.f32 %v490_v50, %v421_v39 }
 0x136   : > { %v499_v49 = vsel %vm358_vm0, %v495_v46, 0.0 }
 0x137   : > { %500 = vadd.xlane.f32.xlu1 %v499_v49  ;;  %v504_v51 = vmax.f32 %v502_v48, 0.0  ;;  %v505_v54 = vmax.f32 %v503_v53, 0.0 }
 0x139   : > { %v506_v52 = vsel %vm358_vm0, %v504_v51, 0.0  ;;  %v509_v55 = vsel %vm358_vm0, %v505_v54, 0.0  ;;  %v534_v54 = vstv %s512_s12 }
 0x13a   : > { %507 = vadd.xlane.f32.xlu0 %v506_v52 }
 0x142   : > { %510 = vadd.xlane.f32.xlu0 %v509_v55 }
 0x1a2   : > { %v498_v56 = vpop.xlane.xlu1 %497 }
 0x1a3   : > { %v699_v2 = vadd.f32 -1.0, %v498_v56 }
 0x1a5   : > { %v515_v7 = vmax.f32 %v699_v2, 0.0 }
 0x1a7   : > { %v517_v12 = vmul.f32 %v515_v7, %v515_v7 }
 0x1aa   : > { %v501_v60 = vpop.xlane.xlu1 %500 }
 0x1ab   : > { %v700_v63 = vadd.f32 -1.0, %v501_v60 }
 0x1ad   : > { %v508_v57 = vpop.xlane.xlu0 %507  ;;  %v516_v4 = vmax.f32 %v700_v63, 0.0 }
 0x1ae   : > { %v536_v58 = vsub.f32 15.0, %v508_v57 }
 0x1af   : > { %v518_v10 = vmul.f32 %v516_v4, %v516_v4 }
 0x1b0   : > { %v540_v59 = vand.u32 2147483647, %v536_v58  ;;  %v538_v36 = vmax.f32 %v536_v58, 0.0 }
 0x1b1   : > { %v519_v14 = vadd.f32 %v518_v10, %v517_v12 }
 0x1b2   : > { %v542_v61 = vsub.f32 0.0, %v540_v59 }
 0x1b3   : > { %v520_v17 = vrot.slane %v519_v14, 4 }
 0x1b4   : > { %v544_v62 = vmul.f32 1.442695, %v542_v61 }
 0x1b5   : > { %v511_v0 = vpop.xlane.xlu0 %510  ;;  %v521_v23 = vadd.f32 %v520_v17, %v519_v14 }
 0x1b6   : > { %730 = vpow2.f32 %v544_v62  ;;  %v537_v1 = vsub.f32 15.0, %v511_v0 }
 0x1b7   : > { %v522_v31 = vrot.slane %v521_v23, 2 }
 0x1b8   : > { %v541_v3 = vand.u32 2147483647, %v537_v1  ;;  %v539_v37 = vmax.f32 %v537_v1, 0.0 }
 0x1b9   : > { %v523_v39 = vadd.f32 %v522_v31, %v521_v23 }
 0x1ba   : > { %v543_v5 = vsub.f32 0.0, %v541_v3 }
 0x1bb   : > { %v524_v44 = vrot.slane %v523_v39, 1 }
 0x1bc   : > { %v731_v8 = vpop.eup %730  ;;  %v546_v9 = vmul.f32 1.442695, %v543_v5 }
 0x1bd   : > { %v548_v11 = vadd.f32 1.0, %v731_v8  ;;  %v551_v16 = vmul.f32 -0.5, %v731_v8  ;;  %v554_v24 = vand.u32 2147483647, %v731_v8  ;;  %v525_v48 = vadd.f32 %v524_v44, %v523_v39 }
 0x1be   : > { %732 = vpow2.f32 %v546_v9 }
 0x1bf   : > { %734 = vrcp.f32 %v769_v13  ;;  %v552_v22 = vadd.f32 1.0, %v551_v16  ;;  %vm555_vm3 = vcmp.lt.f32.partialorder %v554_v24, 0.0004427343 }
 0x1c0   : > { %736 = vlog2.f32 %v548_v11 }
 0x1c1   : > { %v553_v29 = vmul.f32 %v731_v8, %v552_v22 }
 0x1c4   : > { %v733_v15 = vpop.eup %732 }
 0x1c5   : > { %v557_v18 = vadd.f32 1.0, %v733_v15  ;;  %v735_v19 = vpop.eup %734  ;;  %v560_v20 = vmul.f32 -0.5, %v733_v15  ;;  %v563_v28 = vand.u32 2147483647, %v733_v15 }
 0x1c6   : > { %v737_v21 = vpop.eup %736  ;;  %v527_v27 = vmul.f32 16.0, %v735_v19  ;;  %vm531_vm5 = vweird.f32 %v735_v19 }
 0x1c7   : > { %738 = vlog2.f32 %v557_v18  ;;  %v550_v25 = vmul.f32 0.6931472, %v737_v21  ;;  %v561_v26 = vadd.f32 1.0, %v560_v20  ;;  %vm564_vm4 = vcmp.lt.f32.partialorder %v563_v28, 0.0004427343 }
 0x1c8   : > { %v528_v35 = vsub.f32 1.0, %v527_v27 }
 0x1c9   : > { %v556_v32 = vsel %vm555_vm3, %v553_v29, %v550_v25  ;;  %v562_v34 = vmul.f32 %v733_v15, %v561_v26 }
 0x1ca   : > { %v566_v40 = vadd.f32 %v556_v32, %v538_v36  ;;  %v529_v42 = vmul.f32 %v735_v19, %v528_v35 }
 0x1cc   : > { %v530_v46 = vadd.f32 %v735_v19, %v529_v42 }
 0x1cd   : > { %v739_v30 = vpop.eup %738 }
 0x1ce   : > { %v559_v33 = vmul.f32 0.6931472, %v739_v30  ;;  %v532_v50 = vsel %vm531_vm5, %v735_v19, %v530_v46 }
 0x1cf   : > { %v533_v52 = vmul.f32 %v532_v50, %v525_v48 }
 0x1d0   : > { %v565_v38 = vsel %vm564_vm4, %v562_v34, %v559_v33 }
 0x1d1   : > { %v567_v41 = vadd.f32 %v565_v38, %v539_v37  ;;  %v535_v56 = vmul.f32 %v534_v54, %v533_v52 }
 0x1d3   : > { %v568_v43 = vadd.f32 %v567_v41, %v566_v40 }
 0x1d5   : > { %v569_v45 = vrot.slane %v568_v43, 4 }
 0x1d7   : > { %v570_v47 = vadd.f32 %v569_v45, %v568_v43 }
 0x1d9   : > { %v571_v49 = vrot.slane %v570_v47, 2 }
 0x1db   : > { %v572_v51 = vadd.f32 %v571_v49, %v570_v47 }
 0x1dd   : > { %v573_v53 = vrot.slane %v572_v51, 1 }
 0x1df   : > { %v574_v55 = vadd.f32 %v573_v53, %v572_v51 }
 0x1e1   : > { %v575_v57 = vmul.f32 %v574_v55, %v532_v50 }
 0x1e3   : > { %v577_v58 = vsel %vm576_vm6, %v535_v56, %v575_v57 }
 0x1e4   : > { %580 = vperm.xlu2 %726, %v577_v58  }
 0x23e   : > { %v581_v59 = vpop.permute.xlu2 %580 }
 0x23f   : > { %583 = vst [vmem:[%s338_s15] sm:$0x3] %v581_v59 }
 0x240 PF: > { %s18_s24 = sadd.s32 1, %s765_s24  }
 0x241   : > { %p15_p7 = scmp.ge.s32.totalorder %s18_s24, 4  }
 0x243   :  { %17 = sbr.rel (!%p15_p7) target bundleno = 1 (0x1), region = 92 }
 0x248   :  { %603 = vsyncpa [#allocation3], 1 }
 0x249   :  { %605 = vsyncpa [#allocation3 + $0x1], 1 }

</bundles_post_ra>
